<compile_context>
chip_gen: v7x
topology: tpu7x:2x2x1
jax: 0.10.0
libtpu: 0.0.40
codegen_flags: <defaults>
</compile_context>

<pallas_src>
import jax
import jax.numpy as jnp
from jax.experimental import pallas as pl
from jax.experimental.pallas import tpu as pltpu


def _round_up(a, b):
    return (a + b - 1) // b * b


def _cdiv(a, b):
    return -(-a // b)


def _num_tensorcores_per_chip():
    """Best-effort TC-per-chip detection (v7x = 2, earlier generations = 1)."""
    try:
        kind = jax.devices()[0].device_kind.lower()
    except Exception:
        return 1
    return 2 if "v7" in kind else 1


def _reverse_diffusion_kernel(xT_ref, w1T_ref, b1_ref, w2T_ref, b2_ref,
                              w3T_ref, b3_ref, oT_ref):
    """Feature-major MLP([C,H,H,C]) on one lane tile of points."""
    C = xT_ref.shape[0]

    # ---- Layer 1 (C -> H) on the VPU ---------------------------------------
    # K = C = 4: pathological on the MXU, so do C broadcast FMAs instead.
    x = xT_ref[...].astype(jnp.float32)            # [C, tile]
    w1 = w1T_ref[...].astype(jnp.float32)          # [H, C]
    acc = w1[:, 0:1] * x[0:1, :] + b1_ref[...]     # [H, tile], f32
    for c in range(1, C):                          # static unroll, C is tiny
        acc = acc + w1[:, c:c + 1] * x[c:c + 1, :]
    h = jnp.maximum(acc, 0.0)                      # [H, tile], f32

    # ---- Layer 2 (H -> H) on the MXU ----------------------------------------
    w2 = w2T_ref[...]                              # [H, H] (bf16 by default)
    h = jnp.dot(w2, h.astype(w2.dtype), preferred_element_type=jnp.float32)
    h = jnp.maximum(h + b2_ref[...], 0.0)          # [H, tile], f32

    # ---- Layer 3 (H -> C) on the MXU ----------------------------------------
    w3 = w3T_ref[...]                              # [C, H]
    out = jnp.dot(w3, h.astype(w3.dtype), preferred_element_type=jnp.float32)
    oT_ref[...] = (out + b3_ref[...]).astype(oT_ref.dtype)   # [C, tile] lane-dense


def reverse_diffusion_forward(x, t, params, *, m_tile=2048,
                              compute_dtype=jnp.bfloat16):
    """ReverseDiffusion.forward(x, t) == MLP([C, H, H, C])(x); `t` is unused.

    x: [B, N, C].  Computed feature-major (Y^T = W^T @ X^T) with the point axis
    padded to a multiple of 128 and mapped to the TPU lane dim.

    compute_dtype controls the MXU-input dtype for layers 2/3 only (weights and
    the intermediate activation); accumulation, biases, ReLU, layer 1 (VPU) and
    the output stay f32.  bf16 is the native MXU rate on v5e/v6e/v7x; pass
    jnp.float32 for bit-tight results.
    """
    del t  # the PyTorch forward ignores t: return self.mlp(x)
    assert m_tile % 128 == 0, "m_tile must be a multiple of 128 (lane width)"
    B, N, C = x.shape
    M = B * N

    w1, b1 = params["w1"], params["b1"]
    w2, b2 = params["w2"], params["b2"]
    w3, b3 = params["w3"], params["b3"]
    H = w1.shape[1]

    # Cap the lane tile so the ~4 live [H, tile] f32 intermediates stay well
    # under the scoped VMEM limit (re-derived for v7x's 64 MiB physical VMEM;
    # v5e/v6e have 128 MiB and could afford larger tiles).
    act_budget = 16 * 1024 * 1024
    max_tile = max(128, (act_budget // (4 * H * 4)) // 128 * 128)
    tile_target = min(m_tile, max_tile)

    # Choose the grid: spread the padded point axis evenly over the tiles so
    # the last grid step is never nearly empty, and keep >= 2 "parallel" steps
    # on v7x (2 TensorCores/chip) when there is enough work to split.
    m_pad128 = _round_up(max(M, 1), 128)
    n_tiles = _cdiv(m_pad128, tile_target)
    if _num_tensorcores_per_chip() >= 2 and n_tiles == 1 and m_pad128 >= 256:
        n_tiles = 2
    tile = _round_up(_cdiv(m_pad128, n_tiles), 128)
    m_pad = tile * n_tiles
    grid = (n_tiles,)

    # Layout plumbing (feature-major transpose + zero-pad of the point axis).
    # These are cheap XLA copies of a [M, 4] array, not kernel compute.
    xT = x.reshape(M, C).T                              # [C, M], f32 for VPU layer 1
    if m_pad != M:
        xT = jnp.pad(xT, ((0, 0), (0, m_pad - M)))
    w1T = w1.T.astype(jnp.float32)                      # [H, C]  (VPU, f32)
    w2T = w2.T.astype(compute_dtype)                    # [H, H]  (MXU)
    w3T = w3.T.astype(compute_dtype)                    # [C, H]  (MXU)
    b1c = b1.reshape(H, 1).astype(jnp.float32)          # biases broadcast over lanes
    b2c = b2.reshape(H, 1).astype(jnp.float32)
    b3c = b3.reshape(C, 1).astype(jnp.float32)

    out_T = pl.pallas_call(
        _reverse_diffusion_kernel,
        out_shape=jax.ShapeDtypeStruct((C, m_pad), x.dtype),
        grid=grid,
        in_specs=[
            # activations: tiled along the lane (point) axis
            pl.BlockSpec((C, tile), lambda i: (0, i)),
            # weights / biases: full resident blocks across all tiles
            pl.BlockSpec((H, C), lambda i: (0, 0)),
            pl.BlockSpec((H, 1), lambda i: (0, 0)),
            pl.BlockSpec((H, H), lambda i: (0, 0)),
            pl.BlockSpec((H, 1), lambda i: (0, 0)),
            pl.BlockSpec((C, H), lambda i: (0, 0)),
            pl.BlockSpec((C, 1), lambda i: (0, 0)),
        ],
        out_specs=pl.BlockSpec((C, tile), lambda i: (0, i)),
        compiler_params=pltpu.CompilerParams(
            dimension_semantics=("parallel",),
            vmem_limit_bytes=32 * 1024 * 1024,
        ),
    )(xT, w1T, b1c, w2T, b2c, w3T, b3c)

    # Padded lane columns carry ReLU(bias) garbage by construction; slice off.
    return out_T[:, :M].T.reshape(B, N, C)


def init_params(key, in_channels, hidden_channels):
    """Deterministic synthetic parameters for MLP([C, H, H, C])."""
    keys = jax.random.split(key, 6)
    C, H = in_channels, hidden_channels

    def dense(kw, kb, fan_in, fan_out):
        scale = 1.0 / jnp.sqrt(jnp.float32(fan_in))
        w = jax.random.uniform(kw, (fan_in, fan_out), jnp.float32, -scale, scale)
        b = jax.random.uniform(kb, (1, fan_out), jnp.float32, -scale, scale)
        return w, b

    w1, b1 = dense(keys[0], keys[1], C, H)
    w2, b2 = dense(keys[2], keys[3], H, H)
    w3, b3 = dense(keys[4], keys[5], H, C)
    return {"w1": w1, "b1": b1, "w2": w2, "b2": b2, "w3": w3, "b3": b3}


def reference_forward(x, params):
    """Pure-JAX reference of the same MLP for correctness checks."""
    B, N, C = x.shape
    h = x.reshape(B * N, C)
    h = jnp.maximum(h @ params["w1"] + params["b1"], 0.0)
    h = jnp.maximum(h @ params["w2"] + params["b2"], 0.0)
    h = h @ params["w3"] + params["b3"]
    return h.reshape(B, N, C)


if __name__ == "__main__":
    key = jax.random.PRNGKey(0)
    k_param, k_x, k_param2, k_x2 = jax.random.split(key, 4)

    # --- small test consistent with the module (single-block fast path) ------
    B, N = 2, 16           # batch, number of points
    in_channels = 4        # per-point feature channels
    hidden_channels = 32   # small hidden width for the synthetic test

    params = init_params(k_param, in_channels, hidden_channels)
    x = jax.random.normal(k_x, (B, N, in_channels), dtype=jnp.float32)
    t = jnp.zeros((B,), dtype=jnp.int32)  # unused by the forward pass
    ref = reference_forward(x, params)

    # Default path: bf16 MXU inputs, f32 accumulation/epilogue.
    out = jax.block_until_ready(reverse_diffusion_forward(x, t, params))
    assert out.shape == x.shape
    assert jnp.allclose(out, ref, atol=5e-2, rtol=5e-2)

    # Exact-dtype path (f32 everywhere) for bit-tight comparison.
    out_f32 = jax.block_until_ready(
        reverse_diffusion_forward(x, t, params, compute_dtype=jnp.float32))
    assert jnp.allclose(out_f32, ref, atol=1e-5, rtol=1e-5)

    # --- multi-tile grid + lane-padding path (M=600, m_tile=256 -> 3 tiles of
    #     256 lanes, module-default hidden width 256) --------------------------
    B2, N2, H2 = 2, 300, 256
    params2 = init_params(k_param2, in_channels, H2)
    x2 = jax.random.normal(k_x2, (B2, N2, in_channels), dtype=jnp.float32)
    ref2 = reference_forward(x2, params2)

    out2 = jax.block_until_ready(
        reverse_diffusion_forward(x2, t, params2, m_tile=256))
    assert out2.shape == x2.shape
    assert jnp.allclose(out2, ref2, atol=5e-2, rtol=5e-2)

    out2_f32 = jax.block_until_ready(
        reverse_diffusion_forward(x2, t, params2, m_tile=256,
                                  compute_dtype=jnp.float32))
    assert jnp.allclose(out2_f32, ref2, atol=1e-4, rtol=1e-4)

    print("KERNEL_OK")
</pallas_src>

<mosaic_0001>
module attributes {stable_mosaic.version = 11 : i64} {
  func.func @_reverse_diffusion_kernel(%arg0: i32, %arg1: memref<4x128xf32, #tpu.memory_space<vmem>>, %arg2: memref<32x4xf32, #tpu.memory_space<vmem>>, %arg3: memref<32x1xf32, #tpu.memory_space<vmem>>, %arg4: memref<32x32xbf16, #tpu.memory_space<vmem>>, %arg5: memref<32x1xf32, #tpu.memory_space<vmem>>, %arg6: memref<4x32xbf16, #tpu.memory_space<vmem>>, %arg7: memref<4x1xf32, #tpu.memory_space<vmem>>, %arg8: memref<4x128xf32, #tpu.memory_space<vmem>>) attributes {dimension_semantics = [#tpu.dimension_semantics<parallel>], iteration_bounds = array<i64: 1>, scalar_prefetch = 0 : i64, scratch_operands = 0 : i64, tpu.core_type = #tpu.core_type<tc>, window_params = [{transform_indices = @transform_0, window_bounds = array<i64: 4, 128>}, {pipeline_mode = #tpu.pipeline_mode<synchronous>, transform_indices = @transform_1, window_bounds = array<i64: 32, 4>}, {pipeline_mode = #tpu.pipeline_mode<synchronous>, transform_indices = @transform_2, window_bounds = array<i64: 32, 1>}, {pipeline_mode = #tpu.pipeline_mode<synchronous>, transform_indices = @transform_3, window_bounds = array<i64: 32, 32>}, {pipeline_mode = #tpu.pipeline_mode<synchronous>, transform_indices = @transform_4, window_bounds = array<i64: 32, 1>}, {pipeline_mode = #tpu.pipeline_mode<synchronous>, transform_indices = @transform_5, window_bounds = array<i64: 4, 32>}, {pipeline_mode = #tpu.pipeline_mode<synchronous>, transform_indices = @transform_6, window_bounds = array<i64: 4, 1>}, {transform_indices = @transform_7, window_bounds = array<i64: 4, 128>}]} {
    %c0 = arith.constant 0 : index
    %c0_0 = arith.constant 0 : index
    %0 = vector.load %arg1[%c0, %c0_0] : memref<4x128xf32, #tpu.memory_space<vmem>>, vector<4x128xf32>
    %c0_1 = arith.constant 0 : index
    %c0_2 = arith.constant 0 : index
    %1 = vector.load %arg2[%c0_1, %c0_2] : memref<32x4xf32, #tpu.memory_space<vmem>>, vector<32x4xf32>
    %2 = vector.extract_strided_slice %1 {offsets = [0, 0], sizes = [32, 1], strides = [1, 1]} : vector<32x4xf32> to vector<32x1xf32>
    %3 = vector.extract_strided_slice %0 {offsets = [0, 0], sizes = [1, 128], strides = [1, 1]} : vector<4x128xf32> to vector<1x128xf32>
    %4 = vector.broadcast %2 : vector<32x1xf32> to vector<32x128xf32>
    %5 = vector.broadcast %3 : vector<1x128xf32> to vector<32x128xf32>
    %6 = arith.mulf %4, %5 : vector<32x128xf32>
    %c0_3 = arith.constant 0 : index
    %c0_4 = arith.constant 0 : index
    %7 = vector.load %arg3[%c0_3, %c0_4] : memref<32x1xf32, #tpu.memory_space<vmem>>, vector<32x1xf32>
    %8 = vector.broadcast %7 : vector<32x1xf32> to vector<32x128xf32>
    %9 = arith.addf %6, %8 : vector<32x128xf32>
    %10 = vector.extract_strided_slice %1 {offsets = [0, 1], sizes = [32, 1], strides = [1, 1]} : vector<32x4xf32> to vector<32x1xf32>
    %11 = vector.extract_strided_slice %0 {offsets = [1, 0], sizes = [1, 128], strides = [1, 1]} : vector<4x128xf32> to vector<1x128xf32>
    %12 = vector.broadcast %10 : vector<32x1xf32> to vector<32x128xf32>
    %13 = vector.broadcast %11 : vector<1x128xf32> to vector<32x128xf32>
    %14 = arith.mulf %12, %13 : vector<32x128xf32>
    %15 = arith.addf %9, %14 : vector<32x128xf32>
    %16 = vector.extract_strided_slice %1 {offsets = [0, 2], sizes = [32, 1], strides = [1, 1]} : vector<32x4xf32> to vector<32x1xf32>
    %17 = vector.extract_strided_slice %0 {offsets = [2, 0], sizes = [1, 128], strides = [1, 1]} : vector<4x128xf32> to vector<1x128xf32>
    %18 = vector.broadcast %16 : vector<32x1xf32> to vector<32x128xf32>
    %19 = vector.broadcast %17 : vector<1x128xf32> to vector<32x128xf32>
    %20 = arith.mulf %18, %19 : vector<32x128xf32>
    %21 = arith.addf %15, %20 : vector<32x128xf32>
    %22 = vector.extract_strided_slice %1 {offsets = [0, 3], sizes = [32, 1], strides = [1, 1]} : vector<32x4xf32> to vector<32x1xf32>
    %23 = vector.extract_strided_slice %0 {offsets = [3, 0], sizes = [1, 128], strides = [1, 1]} : vector<4x128xf32> to vector<1x128xf32>
    %24 = vector.broadcast %22 : vector<32x1xf32> to vector<32x128xf32>
    %25 = vector.broadcast %23 : vector<1x128xf32> to vector<32x128xf32>
    %26 = arith.mulf %24, %25 : vector<32x128xf32>
    %27 = arith.addf %21, %26 : vector<32x128xf32>
    %cst = arith.constant 0.000000e+00 : f32
    %28 = vector.broadcast %cst : f32 to vector<32x128xf32>
    %29 = arith.maximumf %27, %28 : vector<32x128xf32>
    %c0_5 = arith.constant 0 : index
    %c0_6 = arith.constant 0 : index
    %30 = vector.load %arg4[%c0_5, %c0_6] : memref<32x32xbf16, #tpu.memory_space<vmem>>, vector<32x32xbf16>
    %31 = arith.truncf %29 : vector<32x128xf32> to vector<32x128xbf16>
    %cst_7 = arith.constant dense<0.000000e+00> : vector<32x128xf32>
    %32 = tpu.matmul %30, %31, %cst_7 {dimension_numbers = #tpu.dot_dimension_numbers<[1], [0], [0], [1], [0, 0, 1, 1], [], []>} : vector<32x32xbf16>, vector<32x128xbf16>, vector<32x128xf32> -> vector<32x128xf32>
    %c0_8 = arith.constant 0 : index
    %c0_9 = arith.constant 0 : index
    %33 = vector.load %arg5[%c0_8, %c0_9] : memref<32x1xf32, #tpu.memory_space<vmem>>, vector<32x1xf32>
    %34 = vector.broadcast %33 : vector<32x1xf32> to vector<32x128xf32>
    %35 = arith.addf %32, %34 : vector<32x128xf32>
    %cst_10 = arith.constant 0.000000e+00 : f32
    %36 = vector.broadcast %cst_10 : f32 to vector<32x128xf32>
    %37 = arith.maximumf %35, %36 : vector<32x128xf32>
    %c0_11 = arith.constant 0 : index
    %c0_12 = arith.constant 0 : index
    %38 = vector.load %arg6[%c0_11, %c0_12] : memref<4x32xbf16, #tpu.memory_space<vmem>>, vector<4x32xbf16>
    %39 = arith.truncf %37 : vector<32x128xf32> to vector<32x128xbf16>
    %cst_13 = arith.constant dense<0.000000e+00> : vector<4x128xf32>
    %40 = tpu.matmul %38, %39, %cst_13 {dimension_numbers = #tpu.dot_dimension_numbers<[1], [0], [0], [1], [0, 0, 1, 1], [], []>} : vector<4x32xbf16>, vector<32x128xbf16>, vector<4x128xf32> -> vector<4x128xf32>
    %c0_14 = arith.constant 0 : index
    %c0_15 = arith.constant 0 : index
    %41 = vector.load %arg7[%c0_14, %c0_15] : memref<4x1xf32, #tpu.memory_space<vmem>>, vector<4x1xf32>
    %42 = vector.broadcast %41 : vector<4x1xf32> to vector<4x128xf32>
    %43 = arith.addf %40, %42 : vector<4x128xf32>
    %c0_16 = arith.constant 0 : index
    %c0_17 = arith.constant 0 : index
    %44 = vector.load %arg8[%c0_16, %c0_17] : memref<4x128xf32, #tpu.memory_space<vmem>>, vector<4x128xf32>
    tpu.vector_store %arg8[%c0_16, %c0_17], %43 {strides = array<i32>} : memref<4x128xf32, #tpu.memory_space<vmem>>, vector<4x128xf32>,
    return
  }
  func.func @transform_0(%arg0: i32) -> (i32, i32) {
    %c0_i32 = arith.constant 0 : i32
    %c0_i32_0 = arith.constant 0 : i32
    return %c0_i32, %arg0 : i32, i32
  }
  func.func @transform_1(%arg0: i32) -> (i32, i32) {
    %c0_i32 = arith.constant 0 : i32
    %c0_i32_0 = arith.constant 0 : i32
    %c0_i32_1 = arith.constant 0 : i32
    return %c0_i32, %c0_i32_0 : i32, i32
  }
  func.func @transform_2(%arg0: i32) -> (i32, i32) {
    %c0_i32 = arith.constant 0 : i32
    %c0_i32_0 = arith.constant 0 : i32
    %c0_i32_1 = arith.constant 0 : i32
    return %c0_i32, %c0_i32_0 : i32, i32
  }
  func.func @transform_3(%arg0: i32) -> (i32, i32) {
    %c0_i32 = arith.constant 0 : i32
    %c0_i32_0 = arith.constant 0 : i32
    %c0_i32_1 = arith.constant 0 : i32
    return %c0_i32, %c0_i32_0 : i32, i32
  }
  func.func @transform_4(%arg0: i32) -> (i32, i32) {
    %c0_i32 = arith.constant 0 : i32
    %c0_i32_0 = arith.constant 0 : i32
    %c0_i32_1 = arith.constant 0 : i32
    return %c0_i32, %c0_i32_0 : i32, i32
  }
  func.func @transform_5(%arg0: i32) -> (i32, i32) {
    %c0_i32 = arith.constant 0 : i32
    %c0_i32_0 = arith.constant 0 : i32
    %c0_i32_1 = arith.constant 0 : i32
    return %c0_i32, %c0_i32_0 : i32, i32
  }
  func.func @transform_6(%arg0: i32) -> (i32, i32) {
    %c0_i32 = arith.constant 0 : i32
    %c0_i32_0 = arith.constant 0 : i32
    %c0_i32_1 = arith.constant 0 : i32
    return %c0_i32, %c0_i32_0 : i32, i32
  }
  func.func @transform_7(%arg0: i32) -> (i32, i32) {
    %c0_i32 = arith.constant 0 : i32
    %c0_i32_0 = arith.constant 0 : i32
    return %c0_i32, %arg0 : i32, i32
  }
}

</mosaic_0001>

<bundles_post_ra>
// kernel: tpu_custom_call.1
= control target key start
LH: loop header
LB: loop body
LE: loop exit
PB: predicated region body
PF: predicated region fallthrough
CT: control target
= control target key end

     0   :  { %v419_v2 = vmov 0   ;;  %s532_s0 = inlined_call_operand.vmem [shape: f32[4,128], index: 0, kind: input, shape index: {}]   ;;  %s533_s1 = inlined_call_operand.vmem [shape: f32[32,4], index: 1, kind: input, shape index: {}]   ;;  %s534_s2 = inlined_call_operand.vmem [shape: f32[32,1], index: 2, kind: input, shape index: {}]   ;;  %s535_s3 = inlined_call_operand.vmem [shape: bf16[32,32], index: 3, kind: input, shape index: {}]   ;;  %s536_s4 = inlined_call_operand.vmem [shape: f32[32,1], index: 4, kind: input, shape index: {}]   ;;  %s537_s5 = inlined_call_operand.vmem [shape: bf16[4,32], index: 5, kind: input, shape index: {}]   ;;  %s538_s6 = inlined_call_operand.vmem [shape: f32[4,1], index: 6, kind: input, shape index: {}]   ;;  %s539_s7 = inlined_call_operand.hbm [shape: f32[4,128], index: 7, kind: output, shape index: {}]  }
   0x1   :  { %v61_v0 = vld [vmem:[%s534_s2] sm:$0xff]  ;;  %380 = vset.pattern.permute.xlu1 %v419_v2  ;;  %379 = vset.pattern.permute.xlu0 %v419_v2  ;;  %v62_v3 = vld [vmem:[%s534_s2 + $0x8] sm:$0xff] }
   0x2   :  { %v29_v1 = vld [vmem:[%s533_s1] sm:$0xff]  ;;  %67 = vperm.xlu1 %380, %v61_v0   ;;  %v30_v4 = vld [vmem:[%s533_s1 + $0x8] sm:$0xff] }
   0x3   :  { %35 = vperm.xlu0 %379, %v29_v1  }
   0x4   :  { %12 = vsyncpa [#allocation3], 0  ;;  %v32_v5 = vld [vmem:[%s533_s1 + $0x18] sm:$0xff]  ;;  %v420_v6 = vmov 1   ;;  %v63_v7 = vld [vmem:[%s534_s2 + $0x10] sm:$0xff]  ;;  %v421_v9 = vmov 2   ;;  %v53_v24 = vlaneseq }
   0x5   :  { %v31_v8 = vld [vmem:[%s533_s1 + $0x10] sm:$0xff]  ;;  %v422_v10 = vmov 3   ;;  %v64_v11 = vld [vmem:[%s534_s2 + $0x18] sm:$0xff]  ;;  %v393_v12 = vld [vmem:[%s535_s3] sm:$0xff]   ;;  %vm217_vm0 = vcmask 261120   ;;  %vm424_vm1 = vmmov 0  }
   0x6   :  { %72 = vperm.xlu1 %380, %v62_v3   ;;  %360 = vmatprep.mubr.msk.bf16.mxu0 %vm217_vm0, %v393_v12  ;;  %v184_v13 = vld [vmem:[%s536_s4 + $0x8] sm:$0xff]  ;;  %v183_v14 = vld [vmem:[%s536_s4] sm:$0xff]  ;;  %v185_v15 = vld [vmem:[%s536_s4 + $0x10] sm:$0xff]  ;;  %v54_v27 = vshrl.u32 %v53_v24, 7  ;;  %v423_v24 = vmov 0.0   ;;  %s425_s29 = smov [#allocation2]  }
   0x7   :  { %40 = vperm.xlu0 %379, %v30_v4   ;;  %v186_v16 = vld [vmem:[%s536_s4 + $0x18] sm:$0xff]  ;;  %v280_v17 = vld [vmem:[%s538_s6] sm:$0xf]  ;;  %364 = vmatprep.subr.bf16.mxu1 %v423_v24  ;;  %s336_s30 = sshll.u32 %s425_s29, 4  ;;  %s337_s30 = int_to_ptr.vmem [resolvable:$true] %s336_s30 }
   0x8   :  { %v55_v30 = vsub.s32 0, %v54_v27  ;;  %v107_v31 = vsub.s32 1, %v54_v27  ;;  %v28_v32 = vld [vmem:[%s532_s0] sm:$0xf]  ;;  %v135_v36 = vsub.s32 2, %v54_v27  ;;  %v163_v39 = vsub.s32 3, %v54_v27  ;;  %368 = vmatprep.mubr.msk.bf16.mxu1 %vm424_vm1, %v423_v24  ;;  %p400_p1 = scmp.lt.s32.totalorder %s337_s30, %s337_s30 }
   0x9   :  { %s395_s8 = scalar_lea.vmem %s337_s30, 64 }
   0xa   :  { %381 = vset.pattern.permute.xlu1 %v420_v6  ;;  %v56_v34 = vrot.slane %v28_v32, %v55_v30  ;;  %v108_v35 = vrot.slane %v28_v32, %v107_v31  ;;  %v136_v43 = vrot.slane %v28_v32, %v135_v36  ;;  %v164_v47 = vrot.slane %v28_v32, %v163_v39  ;;  %p396_p0 = scmp.ne.s32.totalorder %s337_s30, %s395_s8  ;;  %p401_p2 = scmp.lt.s32.totalorder %s395_s8, %s395_s8 }
   0xb   :  { %50 = vperm.xlu0 %379, %v32_v5   ;;  %94 = vperm.xlu1 %381, %v30_v4  }
   0xc   :  { %p402_p3 = por %p401_p2, %p400_p1 }
   0xe   :  { %p403_p4 = pnand %p402_p3, %p396_p0 }
   0xf   :  { %77 = vperm.xlu0 %379, %v63_v7   ;;  %382 = vset.pattern.permute.xlu1 %v419_v2 }
  0x10   :  { %45 = vperm.xlu1 %382, %v31_v8  }
  0x13   :  { %384 = vset.pattern.permute.xlu0 %v420_v6 }
  0x14   :  { %90 = vperm.xlu0 %384, %v29_v1   ;;  %383 = vset.pattern.permute.xlu1 %v421_v9 }
  0x15   :  { %118 = vperm.xlu1 %383, %v29_v1  }
  0x18   :  { %98 = vperm.xlu0 %384, %v31_v8  }
  0x19   :  { %122 = vperm.xlu1 %383, %v30_v4  }
  0x1c   :  { %388 = vset.pattern.permute.xlu0 %v422_v10 }
  0x1d   :  { %150 = vperm.xlu0 %388, %v30_v4   ;;  %385 = vset.pattern.permute.xlu1 %v419_v2 }
  0x1e   :  { %82 = vperm.xlu1 %385, %v64_v11  }
  0x21   :  { %154 = vperm.xlu0 %388, %v31_v8  }
  0x22   :  { %386 = vset.pattern.permute.xlu1 %v420_v6 }
  0x23   :  { %102 = vperm.xlu1 %386, %v32_v5  }
  0x25   :  { %391 = vset.pattern.permute.xlu0 %v419_v2 }
  0x26   :  { %189 = vperm.xlu0 %391, %v183_v14  }
  0x27   :  { %387 = vset.pattern.permute.xlu1 %v422_v10 }
  0x28   :  { %146 = vperm.xlu1 %387, %v29_v1  }
  0x2a   :  { %204 = vperm.xlu0 %391, %v186_v16  }
  0x2c   :  { %389 = vset.pattern.permute.xlu1 %v421_v9 }
  0x2d   :  { %126 = vperm.xlu1 %389, %v31_v8  }
  0x31   :  { %130 = vperm.xlu1 %389, %v32_v5  }
  0x35   :  { %390 = vset.pattern.permute.xlu1 %v422_v10 }
  0x36   :  { %158 = vperm.xlu1 %390, %v32_v5  }
  0x3a   :  { %392 = vset.pattern.permute.xlu1 %v419_v2 }
  0x3b   :  { %194 = vperm.xlu1 %392, %v184_v13  }
  0x3f   :  { %199 = vperm.xlu1 %392, %v185_v15  }
  0x43   :  { %283 = vperm.xlu1 %392, %v280_v17  }
  0x81   :  { %v68_v18 = vpop.permute.xlu1 %67 }
  0x82   :  { %v36_v19 = vpop.permute.xlu0 %35 }
  0x83   :  { %v57_v41 = vmul.f32 %v56_v34, %v36_v19 }
  0x85   :  { %v73_v20 = vpop.permute.xlu1 %72  ;;  %v85_v49 = vadd.f32 %v68_v18, %v57_v41 }
  0x86   :  { %v41_v21 = vpop.permute.xlu0 %40 }
  0x87   :  { %v58_v38 = vmul.f32 %v56_v34, %v41_v21 }
  0x89   :  { %v86_v44 = vadd.f32 %v73_v20, %v58_v38 }
  0x8a   :  { %v51_v22 = vpop.permute.xlu0 %50  ;;  %v95_v23 = vpop.permute.xlu1 %94 }
  0x8b   :  { %v110_v42 = vmul.f32 %v108_v35, %v95_v23  ;;  %v60_v6 = vmul.f32 %v56_v34, %v51_v22  ;;  %v394_v22 = vld [vmem:[%s535_s3 + $0x8] sm:$0xff]  }
  0x8d   :  { %v114_v50 = vadd.f32 %v110_v42, %v86_v44 }
  0x8e   :  { %v78_v25 = vpop.permute.xlu0 %77 }
  0x8f   :  { %v46_v26 = vpop.permute.xlu1 %45 }
  0x90   :  { %v59_v60 = vmul.f32 %v56_v34, %v46_v26 }
  0x92   :  { %v87_v2 = vadd.f32 %v78_v25, %v59_v60 }
  0x93   :  { %v91_v29 = vpop.permute.xlu0 %90 }
  0x94   :  { %v119_v28 = vpop.permute.xlu1 %118  ;;  %v109_v45 = vmul.f32 %v108_v35, %v91_v29 }
  0x95   :  { %v137_v53 = vmul.f32 %v136_v43, %v119_v28 }
  0x96   :  { %v113_v52 = vadd.f32 %v109_v45, %v85_v49 }
  0x97   :  { %v99_v37 = vpop.permute.xlu0 %98 }
  0x98   :  { %v123_v33 = vpop.permute.xlu1 %122  ;;  %v141_v57 = vadd.f32 %v137_v53, %v113_v52  ;;  %v111_v62 = vmul.f32 %v108_v35, %v99_v37 }
  0x99   :  { %v138_v46 = vmul.f32 %v136_v43, %v123_v33 }
  0x9a   :  { %v115_v7 = vadd.f32 %v111_v62, %v87_v2 }
  0x9b   :  { %v142_v54 = vadd.f32 %v138_v46, %v114_v50 }
  0x9c   :  { %v151_v48 = vpop.permute.xlu0 %150 }
  0x9d   :  { %v83_v40 = vpop.permute.xlu1 %82  ;;  %v166_v55 = vmul.f32 %v164_v47, %v151_v48 }
  0x9e   :  { %v88_v10 = vadd.f32 %v83_v40, %v60_v6 }
  0x9f   :  { %v170_v58 = vadd.f32 %v166_v55, %v142_v54 }
  0xa0   :  { %v155_v5 = vpop.permute.xlu0 %154 }
  0xa1   :  { %v174_v63 = vmax.f32 %v170_v58, 0.0  ;;  %v167_v12 = vmul.f32 %v164_v47, %v155_v5 }
  0xa2   :  { %v103_v51 = vpop.permute.xlu1 %102 }
  0xa3   :  { %v112_v8 = vmul.f32 %v108_v35, %v103_v51 }
  0xa5   :  { %v116_v14 = vadd.f32 %v112_v8, %v88_v10  ;;  %v190_v26 = vpop.permute.xlu0 %189 }
  0xa7   :  { %v147_v56 = vpop.permute.xlu1 %146 }
  0xa8   :  { %v165_v59 = vmul.f32 %v164_v47, %v147_v56 }
  0xa9   :  { %v205_v29 = vpop.permute.xlu0 %204 }
  0xaa   :  { %v169_v61 = vadd.f32 %v165_v59, %v141_v57 }
  0xac   :  { %v173_v0 = vmax.f32 %v169_v61, 0.0  ;;  %v127_v1 = vpop.permute.xlu1 %126 }
  0xad   :  { %v139_v3 = vmul.f32 %v136_v43, %v127_v1 }
  0xae   :  { %v181_v4 = vpack.c.bf16 %v174_v63, %v173_v0 }
  0xaf   :  { %v143_v11 = vadd.f32 %v139_v3, %v115_v7 }
  0xb0   :  { %v131_v9 = vpop.permute.xlu1 %130  ;;  %356 = vmatprep.subr.bf16.mxu0 %v181_v4 }
  0xb1   :  { %357 = vmatpush3.bf16.msra.mxu0 %v181_v4  ;;  %v140_v13 = vmul.f32 %v136_v43, %v131_v9  ;;  %v171_v16 = vadd.f32 %v167_v12, %v143_v11  ;;  %v277_v43 = vld [vmem:[%s537_s5] sm:$0x3] }
  0xb3   :  { %v144_v17 = vadd.f32 %v140_v13, %v116_v14  ;;  %v175_v20 = vmax.f32 %v171_v16, 0.0 }
  0xb5   :  { %v159_v15 = vpop.permute.xlu1 %158 }
  0xb6   :  { %v168_v18 = vmul.f32 %v164_v47, %v159_v15 }
  0xb8   :  { %v172_v19 = vadd.f32 %v168_v18, %v144_v17 }
  0xba   :  { %v176_v21 = vmax.f32 %v172_v19, 0.0  ;;  %v195_v25 = vpop.permute.xlu1 %194 }
  0xbc   :  { %v182_v23 = vpack.c.bf16 %v176_v21, %v175_v20 }
  0xbe   :  { %358 = vmatprep.subr.bf16.mxu0 %v182_v23  ;;  %v200_v27 = vpop.permute.xlu1 %199 }
  0xbf   :  { %359 = vmatpush3.bf16.msra.mxu0 %v182_v23 }
  0xc2   :  { %361 = vmatmul.mubr.msk.bf16.vlgmr.msra.gmra.mrb[0].mxu0 %vm217_vm0, %v394_v22  ;;  %v284_v44 = vpop.permute.xlu1 %283 }
 0x195   :  { %v362_v28 = vpop.f32.mrb[0].mxu0 }
 0x196   :  { %v267_v30 = vadd.f32 %v362_v28, %v200_v27  ;;  %v258_v31 = vpop.f32.mrb[1].mxu0 }
 0x197   :  { %v259_v32 = vadd.f32 %v258_v31, %v190_v26  ;;  %v363_v33 = vpop.f32.mrb[2].mxu0 }
 0x198   :  { %v270_v34 = vadd.f32 %v363_v33, %v205_v29  ;;  %v261_v35 = vpop.f32.mrb[3].mxu0  ;;  %v275_v37 = vmax.f32 %v267_v30, 0.0 }
 0x199   :  { %v262_v36 = vadd.f32 %v261_v35, %v195_v25  ;;  %v273_v39 = vmax.f32 %v259_v32, 0.0 }
 0x19a   :  { %v276_v38 = vmax.f32 %v270_v34, 0.0 }
 0x19b   :  { %v274_v40 = vmax.f32 %v262_v36, 0.0 }
 0x19c   :  { %v279_v41 = vpack.c.bf16 %v276_v38, %v275_v37 }
 0x19d   :  { %v278_v42 = vpack.c.bf16 %v274_v40, %v273_v39 }
 0x19f   :  { %365 = vmatpush3.bf16.msra.mxu1 %v278_v42 }
 0x1a0   :  { %366 = vmatprep.subr.bf16.mxu1 %v423_v24 }
 0x1a3   :  { %367 = vmatpush3.bf16.msra.mxu1 %v279_v41 }
 0x1a6   :  { %369 = vmatmul.mubr.msk.bf16.vlgmr.msra.gmra.mrb[0].mxu1 %vm217_vm0, %v277_v43 }
 0x279   :  { %v323_v45 = vpop.f32.mrb[0].mxu1 }
 0x27a   :  { %v324_v46 = vadd.f32 %v323_v45, %v284_v44  ;;  %v370_v47 = vpop.f32.mrb[1].mxu1 }
 0x27b   :  { %v326_v48 = vpop.f32.mrb[2].mxu1 }
 0x27c   :  { %329 = vst [vmem:[#allocation2] sm:$0xf] %v324_v46  ;;  %v371_v49 = vpop.f32.mrb[3].mxu1 }
 0x27d   :  { %406 = shalt.err (!%p403_p4)
}
 0x27e   :  { %s407_s10 = scalar_lea.hbm %s539_s7, 64 }
 0x27f   :  { %p408_p5 = scmp.ne.s32.totalorder %s539_s7, %s407_s10  ;;  %p411_p6 = scmp.lt.u32.totalorder %s407_s10, %s539_s7 }
 0x281   :  { %p413_p7 = pnand %p411_p6, %p408_p5 }
 0x283   :  { %416 = shalt.err (!%p413_p7)
}
 0x284   :  { %339 = dma.vmem_to_hbm [thread:$0]  %s337_s30, 64, %s539_s7, [#allocation3]  }
 0x285   :  { %417 = dma.done.wait [#allocation3], 64  }
 0x286   :  { %418 = vsyncadd [#allocation3], 4294967232 }
 0x287   :  { %343 = vsyncpa [#allocation3], 1 }

</bundles_post_ra>
